<compile_context>
chip_gen: v7x
topology: tpu7x:2x2x1
jax: 0.10.0
libtpu: 0.0.40
codegen_flags: <defaults>
</compile_context>

<pallas_src>
import functools

import jax
import jax.numpy as jnp
from jax import lax
from jax.experimental import pallas as pl
from jax.experimental.pallas import tpu as pltpu

# int32 two's-complement views of the usual murmur3/golden-ratio constants
_GOLDEN = -1640531527      # 0x9E3779B9
_MURMUR_C1 = -2048144789   # 0x85EBCA6B
_MURMUR_C2 = -1028477387   # 0xC2B2AE35


def _srl(h, n):
    """Logical right shift on int32 (arithmetic shift + clear sign-extended bits)."""
    return (h >> n) & jnp.int32((1 << (32 - n)) - 1)


def _counter_uniform(ctr, seed):
    """Counter-based uniform in [0,1): murmur3 fmix32 of (ctr, seed), 24-bit mantissa.

    Pure jnp int32 ops -> identical bits on TPU Mosaic, XLA:TPU and CPU interpret.
    """
    h = ctr + seed * jnp.int32(_GOLDEN)
    h = h ^ _srl(h, 16)
    h = h * jnp.int32(_MURMUR_C1)
    h = h ^ _srl(h, 13)
    h = h * jnp.int32(_MURMUR_C2)
    h = h ^ _srl(h, 16)
    return _srl(h, 8).astype(jnp.float32) * jnp.float32(1.0 / 16777216.0)


def mc_dropout_kernel(seed_ref, prm_ref, x_ref, o_ref, *, neg_half_temp, feat, tile_rows):
    eps = 1e-07
    shp = x_ref.shape                      # (tile_rows, F)

    # --- per-element uniform randoms keyed on the GLOBAL element index -----
    row0 = pl.program_id(0) * tile_rows
    rows = lax.broadcasted_iota(jnp.int32, shp, 0) + row0
    cols = lax.broadcasted_iota(jnp.int32, shp, 1)
    ctr = rows * feat + cols               # unique per element across all tiles
    u = _counter_uniform(ctr, seed_ref[0])

    # --- concrete-dropout math: 3 EUP pushes per element (2 logs + 1 tanh) --
    pt_logit = prm_ref[0]                  # log(pt+eps) - log(1-pt+eps), precomputed scalar
    inv_keep = prm_ref[1]                  # 1 / (1 - sigmoid(p_train)),   precomputed scalar
    arg = pt_logit + jnp.log(u + eps) - jnp.log(1.0 - u + eps)
    # keep = 1 - sigmoid(temp*arg) = sigmoid(-temp*arg) = 0.5*(1 + tanh(-0.5*temp*arg))
    keep = 0.5 * (1.0 + jnp.tanh(neg_half_temp * arg))

    o_ref[...] = (x_ref[...].astype(jnp.float32) * (keep * inv_keep)).astype(o_ref.dtype)


def mc_dropout(x, p_logit, seed, temp, *, tile_rows=None):
    """x: (B, F) float32/bfloat16; p_logit: scalar/(1,) float32; seed: (1,) int32; temp: python float."""
    B, F = x.shape

    # Row-tile size: ~2 MiB lane-dense blocks (full F in the lane axis).
    # Double-buffered in+out = 4 * 2 MiB = 8 MiB, safe for v5e's 16 MiB scoped
    # VMEM default and far under v6e/v7x limits.
    if tile_rows is None:
        bytes_per_row = F * x.dtype.itemsize
        tile_rows = min(B, max(8, (2 * 1024 * 1024) // max(1, bytes_per_row)))
    if tile_rows < B:
        tile_rows = max(8, (tile_rows // 8) * 8)   # sublane-aligned unless full dim
    tile_rows = min(tile_rows, B)
    grid = (pl.cdiv(B, tile_rows),)

    # Hoist all quantities derived from the scalar parameter out of the kernel.
    eps = 1e-07
    p32 = jnp.asarray(p_logit, dtype=jnp.float32).reshape((1,))
    pt = jax.nn.sigmoid(p32)
    pt_logit = jnp.log(pt + eps) - jnp.log(1.0 - pt + eps)
    inv_keep = 1.0 / (1.0 - pt)
    params = jnp.concatenate([pt_logit, inv_keep]).astype(jnp.float32)   # (2,)
    seed = jnp.asarray(seed, dtype=jnp.int32).reshape((1,))

    kernel = functools.partial(
        mc_dropout_kernel,
        neg_half_temp=float(-0.5 * float(temp)),
        feat=int(F),
        tile_rows=int(tile_rows),
    )
    return pl.pallas_call(
        kernel,
        out_shape=jax.ShapeDtypeStruct((B, F), x.dtype),
        grid=grid,
        in_specs=[
            pl.BlockSpec(memory_space=pltpu.SMEM),            # seed scalar
            pl.BlockSpec(memory_space=pltpu.SMEM),            # [pt_logit, inv_keep]
            pl.BlockSpec((tile_rows, F), lambda i: (i, 0)),   # x row-tile, full F (lane-dense)
        ],
        out_specs=pl.BlockSpec((tile_rows, F), lambda i: (i, 0)),
        compiler_params=pltpu.CompilerParams(
            dimension_semantics=("parallel",),                # shard rows across v7x's 2 TCs
        ),
    )(seed, params, x)


def mc_dropout_reference(x, p_logit, seed, temp):
    """Pure-JAX reference with the *original* PyTorch formula, sharing the RNG."""
    eps = 1e-07
    B, F = x.shape
    rows = jnp.arange(B, dtype=jnp.int32)[:, None]
    cols = jnp.arange(F, dtype=jnp.int32)[None, :]
    u = _counter_uniform(rows * jnp.int32(F) + cols, jnp.asarray(seed, jnp.int32).reshape((1,))[0])
    pt = jax.nn.sigmoid(jnp.asarray(p_logit, jnp.float32).reshape((1,))[0])
    ptb = jnp.ones((B, F), dtype=jnp.float32) * pt
    arg = (jnp.log(ptb + eps) - jnp.log(1.0 - ptb + eps)
           + jnp.log(u + eps) - jnp.log(1.0 - u + eps))
    drop_prob = jax.nn.sigmoid(temp * arg)
    out = x.astype(jnp.float32) * (1.0 - drop_prob)
    out = out / (1.0 - pt)
    return out.astype(x.dtype)


def calc_logit(p0):
    p0 = jnp.float32(p0)
    return jnp.log(p0 / (1.0 - p0))


# TODO(synk): only the forward pass is implemented; the learnable p_train parameter
# (requires_grad) / backward pass is out of scope for this kernel.

if __name__ == "__main__":
    key = jax.random.PRNGKey(0)
    B, F = 32, 128                     # small MLP-activation-like shape
    x = jax.random.normal(key, (B, F), dtype=jnp.float32)

    # Deterministic "parameters" matching MCDropout.__init__(p0, temp)
    p0 = 0.1
    temp = 0.1
    p_logit = jnp.reshape(calc_logit(p0), (1,)).astype(jnp.float32)
    seed = jnp.array([1234], dtype=jnp.int32)

    # tile_rows=8 -> grid of 4 row-tiles, exercising the tiled / per-tile-RNG path.
    out = mc_dropout(x, p_logit, seed, temp, tile_rows=8)
    jax.block_until_ready(out)

    ref = mc_dropout_reference(x, p_logit, seed, temp)
    assert out.shape == x.shape and out.dtype == x.dtype
    assert bool(jnp.all(jnp.isfinite(out)))
    assert bool(jnp.allclose(out, ref, rtol=5e-2, atol=5e-2)), float(jnp.max(jnp.abs(out - ref)))
    print("KERNEL_OK")
</pallas_src>

<mosaic_0001>
module attributes {stable_mosaic.version = 11 : i64} {
  func.func @mc_dropout_kernel(%arg0: i32, %arg1: memref<1xi32, #tpu.memory_space<smem>>, %arg2: memref<2xf32, #tpu.memory_space<smem>>, %arg3: memref<8x128xf32, #tpu.memory_space<vmem>>, %arg4: memref<8x128xf32, #tpu.memory_space<vmem>>) attributes {dimension_semantics = [#tpu.dimension_semantics<parallel>], iteration_bounds = array<i64: 4>, scalar_prefetch = 0 : i64, scratch_operands = 0 : i64, tpu.core_type = #tpu.core_type<tc>, window_params = [{transform_indices = @transform_0, window_bounds = array<i64: 1>}, {transform_indices = @transform_1, window_bounds = array<i64: 2>}, {transform_indices = @transform_2, window_bounds = array<i64: 8, 128>}, {transform_indices = @transform_3, window_bounds = array<i64: 8, 128>}]} {
    %c8_i32 = arith.constant 8 : i32
    %0 = arith.muli %arg0, %c8_i32 : i32
    %1 = tpu.iota {dimensions = array<i32: 0>} : vector<8x128xi32>
    %2 = vector.broadcast %0 : i32 to vector<8x128xi32>
    %3 = arith.addi %1, %2 : vector<8x128xi32>
    %4 = tpu.iota {dimensions = array<i32: 1>} : vector<8x128xi32>
    %c128_i32 = arith.constant 128 : i32
    %5 = vector.broadcast %c128_i32 : i32 to vector<8x128xi32>
    %6 = arith.muli %3, %5 : vector<8x128xi32>
    %7 = arith.addi %6, %4 : vector<8x128xi32>
    %c0 = arith.constant 0 : index
    %8 = memref.load %arg1[%c0] : memref<1xi32, #tpu.memory_space<smem>>
    %c-1640531527_i32 = arith.constant -1640531527 : i32
    %9 = arith.muli %8, %c-1640531527_i32 : i32
    %10 = vector.broadcast %9 : i32 to vector<8x128xi32>
    %11 = arith.addi %7, %10 : vector<8x128xi32>
    %c16_i32 = arith.constant 16 : i32
    %12 = vector.broadcast %c16_i32 : i32 to vector<8x128xi32>
    %13 = arith.shrsi %11, %12 : vector<8x128xi32>
    %c65535_i32 = arith.constant 65535 : i32
    %14 = vector.broadcast %c65535_i32 : i32 to vector<8x128xi32>
    %15 = arith.andi %13, %14 : vector<8x128xi32>
    %16 = arith.xori %11, %15 : vector<8x128xi32>
    %c-2048144789_i32 = arith.constant -2048144789 : i32
    %17 = vector.broadcast %c-2048144789_i32 : i32 to vector<8x128xi32>
    %18 = arith.muli %16, %17 : vector<8x128xi32>
    %c13_i32 = arith.constant 13 : i32
    %19 = vector.broadcast %c13_i32 : i32 to vector<8x128xi32>
    %20 = arith.shrsi %18, %19 : vector<8x128xi32>
    %c524287_i32 = arith.constant 524287 : i32
    %21 = vector.broadcast %c524287_i32 : i32 to vector<8x128xi32>
    %22 = arith.andi %20, %21 : vector<8x128xi32>
    %23 = arith.xori %18, %22 : vector<8x128xi32>
    %c-1028477387_i32 = arith.constant -1028477387 : i32
    %24 = vector.broadcast %c-1028477387_i32 : i32 to vector<8x128xi32>
    %25 = arith.muli %23, %24 : vector<8x128xi32>
    %c16_i32_0 = arith.constant 16 : i32
    %26 = vector.broadcast %c16_i32_0 : i32 to vector<8x128xi32>
    %27 = arith.shrsi %25, %26 : vector<8x128xi32>
    %c65535_i32_1 = arith.constant 65535 : i32
    %28 = vector.broadcast %c65535_i32_1 : i32 to vector<8x128xi32>
    %29 = arith.andi %27, %28 : vector<8x128xi32>
    %30 = arith.xori %25, %29 : vector<8x128xi32>
    %c8_i32_2 = arith.constant 8 : i32
    %31 = vector.broadcast %c8_i32_2 : i32 to vector<8x128xi32>
    %32 = arith.shrsi %30, %31 : vector<8x128xi32>
    %c16777215_i32 = arith.constant 16777215 : i32
    %33 = vector.broadcast %c16777215_i32 : i32 to vector<8x128xi32>
    %34 = arith.andi %32, %33 : vector<8x128xi32>
    %35 = arith.sitofp %34 : vector<8x128xi32> to vector<8x128xf32>
    %cst = arith.constant 5.96046448E-8 : f32
    %36 = vector.broadcast %cst : f32 to vector<8x128xf32>
    %37 = arith.mulf %35, %36 : vector<8x128xf32>
    %c0_3 = arith.constant 0 : index
    %38 = memref.load %arg2[%c0_3] : memref<2xf32, #tpu.memory_space<smem>>
    %c1 = arith.constant 1 : index
    %39 = memref.load %arg2[%c1] : memref<2xf32, #tpu.memory_space<smem>>
    %cst_4 = arith.constant 1.000000e-07 : f32
    %40 = vector.broadcast %cst_4 : f32 to vector<8x128xf32>
    %41 = arith.addf %37, %40 : vector<8x128xf32>
    %42 = math.log %41 : vector<8x128xf32>
    %43 = vector.broadcast %38 : f32 to vector<8x128xf32>
    %44 = arith.addf %43, %42 : vector<8x128xf32>
    %cst_5 = arith.constant 1.000000e+00 : f32
    %45 = vector.broadcast %cst_5 : f32 to vector<8x128xf32>
    %46 = arith.subf %45, %37 : vector<8x128xf32>
    %cst_6 = arith.constant 1.000000e-07 : f32
    %47 = vector.broadcast %cst_6 : f32 to vector<8x128xf32>
    %48 = arith.addf %46, %47 : vector<8x128xf32>
    %49 = math.log %48 : vector<8x128xf32>
    %50 = arith.subf %44, %49 : vector<8x128xf32>
    %cst_7 = arith.constant -5.000000e-02 : f32
    %51 = vector.broadcast %cst_7 : f32 to vector<8x128xf32>
    %52 = arith.mulf %51, %50 : vector<8x128xf32>
    %53 = math.tanh %52 : vector<8x128xf32>
    %cst_8 = arith.constant 1.000000e+00 : f32
    %54 = vector.broadcast %cst_8 : f32 to vector<8x128xf32>
    %55 = arith.addf %54, %53 : vector<8x128xf32>
    %cst_9 = arith.constant 5.000000e-01 : f32
    %56 = vector.broadcast %cst_9 : f32 to vector<8x128xf32>
    %57 = arith.mulf %56, %55 : vector<8x128xf32>
    %c0_10 = arith.constant 0 : index
    %c0_11 = arith.constant 0 : index
    %58 = vector.load %arg3[%c0_10, %c0_11] : memref<8x128xf32, #tpu.memory_space<vmem>>, vector<8x128xf32>
    %59 = vector.broadcast %39 : f32 to vector<8x128xf32>
    %60 = arith.mulf %57, %59 : vector<8x128xf32>
    %61 = arith.mulf %58, %60 : vector<8x128xf32>
    %c0_12 = arith.constant 0 : index
    %c0_13 = arith.constant 0 : index
    %62 = vector.load %arg4[%c0_12, %c0_13] : memref<8x128xf32, #tpu.memory_space<vmem>>, vector<8x128xf32>
    tpu.vector_store %arg4[%c0_12, %c0_13], %61 {strides = array<i32>} : memref<8x128xf32, #tpu.memory_space<vmem>>, vector<8x128xf32>,
    return
  }
  func.func @transform_0(%arg0: i32) -> i32 {
    %c0_i32 = arith.constant 0 : i32
    %c0_i32_0 = arith.constant 0 : i32
    return %c0_i32 : i32
  }
  func.func @transform_1(%arg0: i32) -> i32 {
    %c0_i32 = arith.constant 0 : i32
    %c0_i32_0 = arith.constant 0 : i32
    return %c0_i32 : i32
  }
  func.func @transform_2(%arg0: i32) -> (i32, i32) {
    %c0_i32 = arith.constant 0 : i32
    %c0_i32_0 = arith.constant 0 : i32
    return %arg0, %c0_i32 : i32, i32
  }
  func.func @transform_3(%arg0: i32) -> (i32, i32) {
    %c0_i32 = arith.constant 0 : i32
    %c0_i32_0 = arith.constant 0 : i32
    return %arg0, %c0_i32 : i32, i32
  }
}

</mosaic_0001>

<bundles_post_ra>
// kernel: tpu_custom_call.1
= control target key start
LH: loop header
LB: loop body
LE: loop exit
PB: predicated region body
PF: predicated region fallthrough
CT: control target
= control target key end

     0   :  { %s770_s0 = inlined_call_operand.<no memory space> [shape: s32[1], index: 0, kind: input, shape index: {}]   ;;  %s771_s1 = inlined_call_operand.vmem [shape: f32[2], index: 1, kind: input, shape index: {}]   ;;  %s772_s2 = inlined_call_operand.hbm [shape: f32[32,128], index: 2, kind: input, shape index: {}]   ;;  %s773_s3 = inlined_call_operand.hbm [shape: f32[32,128], index: 3, kind: output, shape index: {}]  }
   0x1   :  { %8 = sst [smem:[#allocation2]] %s770_s0 }
   0x2   :  { %9 = vsyncpa [#allocation6], 0 }
   0x3   :  { %10 = vsyncpa [#allocation4], 0 }
   0x4   :  { %12 = vsyncpa [#allocation4 + $0x1], 0 }
   0x5   :  { %13 = vsyncpa [#allocation5], 0 }
   0x6   :  { %15 = vsyncpa [#allocation5 + $0x1], 0  ;;  %s572_s14 = smov 0   ;;  %s574_s15 = smov 0  }
   0x7   :  { %s576_s16 = smov 0   ;;  %s578_s17 = smov 0  }
   0x8 LB: > { %s593_s0 = sadd.s32 4294967295, %s544_s17   ;;  %s346_s18 = sadd.s32 4294967294, %s544_s17   ;;  %s544_s17 = sphi %s578_s17, %s793_s17   ;;  %s540_s16 = sphi %s576_s16, %s792_s16   ;;  %s536_s15 = sphi %s574_s15, %s791_s15   ;;  %s532_s14 = sphi %s572_s14, %s790_s14  }
   0x9   : > { %p83_p0 = scmp.ne.s32.totalorder %s536_s15, %s532_s14  ;;  %p774_p1 = scmp.eq.s32.totalorder %s593_s0, 0 }
   0xa   : > { %p113_p3 = scmp.eq.s32.totalorder %s346_s18, 3  ;;  %p347_p5 = scmp.ge.s32.totalorder %s544_s17, 1 }
   0xb   : > { %p602_p4 = por %p774_p1, %p83_p0  ;;  %p120_p7 = scmp.lt.s32.totalorder %s544_s17, 5 }
   0xc   : > { %p607_p6 = por %p113_p3, %p83_p0  ;;  %s136_s23 = sshll.u32 %s771_s1, 4  ;;  %s137_s23 = int_to_ptr.vmem [resolvable:$true] %s136_s23 }
   0xd   : > { %s777_s19 = scalar_select %p602_p4, 1, 0 }
   0xe   : > { %s778_s20 = scalar_select %p607_p6, 1, 0 }
   0xf   : > { %p615_p8 = pnand %p347_p5, %p120_p7  ;;  %s622_s25 = sadd.s32 1, %s544_s17  }
  0x10   : > { %s67_s27 = ssub.s32 %s544_s17, %s622_s25  ;;  %s70_s29 = sadd.s32 1, %s540_s16 }
  0x11   : > { %p374_p9 = pneg %p615_p8  ;;  %p632_p11 = scmp.eq.s32.totalorder %s67_s27, 0 }
  0x12   : > { %p77_p12 = scmp.ne.s32.totalorder %s540_s16, %s536_s15  ;;  %s429_s30 = scalar_lea.vmem %s137_s23, 16 }
  0x13   : > { %p626_p10 = pnand %p374_p9, %p774_p1  ;;  %p430_p13 = scmp.ne.s32.totalorder %s137_s23, %s429_s30 }
  0x14   : > { %p437_p7 = scmp.lt.s32.totalorder %s137_s23, %s137_s23  ;;  %p438_p2 = scmp.lt.s32.totalorder %s429_s30, %s429_s30 }
  0x15   : > { %p431_p0 = pneg %p626_p10 }
  0x16   : > { %p439_p9 = por %p438_p2, %p437_p7 }
  0x17   : > { %p432_p3 = pnand %p431_p0, %p430_p13 }
  0x19   : > { %p433_p5 = pneg %p432_p3 }
  0x1b   : > { %p440_p1 = pnand %p439_p9, %p433_p5 }
  0x1d   : > { %443 = shalt.err (!%p440_p1)
}
  0x1e   : > { %s546_s4 = smov [#allocation3]   ;;  %p78_p2 = scmp.eq.s32.totalorder %s544_s17, 0 }
  0x1f   : > { %377 = dma.vmem_to_smem (!%p626_p10), %s137_s23, 16, %s546_s4, [#allocation6]  }
  0x20   : > { %s646_s5 = scalar_select %p632_p11, %s540_s16, %s70_s29  }
  0x21   : > { %p782_p1 = scmp.eq.s32.totalorder %s593_s0, 3  ;;  %p387_p0 = scmp.lt.s32.totalorder %s544_s17, 4 }
  0x22   : > { %s147_s7 = sand.u32 1, %s540_s16   ;;  %p79_p3 = por %p78_p2, %p77_p12 }
  0x23   : > { %p654_p13 = por %p782_p1, %p77_p12  ;;  %s350_s8 = sshll.u32 %s147_s7, 3 }
  0x24   : > { %s351_s9 = sshll.u32 %s544_s17, 7  ;;  %s151_s13 = scalar_lea.vmem [#allocation7], %s350_s8 }
  0x25   : > { %s783_s6 = scalar_select %p654_p13, 1, 0 }
  0x26   : > { %s667_s12 = scalar_lea.hbm %s772_s2, %s351_s9  ;;  %s158_s18 = sshll.u32 %s151_s13, 4  ;;  %s673_s18 = int_to_ptr.vmem [resolvable:$true] %s158_s18 }
  0x27   : > { %p669_p10 = pnand %p387_p0, %p79_p3  ;;  %s148_s22 = scalar_lea.sflag [#allocation4], %s147_s7 }
  0x28   : > { %s444_s23 = scalar_lea.hbm %s667_s12, 128  ;;  %s449_s28 = scalar_lea.hbm %s772_s2, 512 }
  0x29   : > { %p445_p11 = scmp.ne.s32.totalorder %s667_s12, %s444_s23  ;;  %p446_p12 = pneg %p669_p10 }
  0x2a   : > { %p450_p9 = scmp.lt.u32.totalorder %s667_s12, %s772_s2  ;;  %p451_p2 = scmp.lt.u32.totalorder %s449_s28, %s444_s23 }
  0x2b   : > { %p447_p5 = pnand %p446_p12, %p445_p11  ;;  %p453_p0 = scmp.lt.u32.totalorder %s444_s23, %s667_s12 }
  0x2c   : > { %p452_p1 = por %p451_p2, %p450_p9 }
  0x2d   : > { %p448_p7 = pneg %p447_p5 }
  0x2e   : > { %p454_p3 = por %p453_p0, %p452_p1 }
  0x30   : > { %p455_p6 = pnand %p454_p3, %p448_p7 }
  0x32   : > { %458 = shalt.err (!%p455_p6)
}
  0x33   : > { %s459_s4 = scalar_lea.vmem %s673_s18, 128  ;;  %s547_s7 = smov [#allocation7]  }
  0x34   : > { %p460_p11 = scmp.ne.s32.totalorder %s673_s18, %s459_s4  ;;  %s464_s8 = sshll.u32 %s547_s7, 4  ;;  %s465_s8 = int_to_ptr.vmem [resolvable:$false] %s464_s8 }
  0x35   : > { %s466_s9 = scalar_lea.vmem %s465_s8, 256  ;;  %p467_p4 = scmp.lt.s32.totalorder %s673_s18, %s465_s8 }
  0x36   : > { %p462_p5 = pnand %p460_p11, %p446_p12  ;;  %p468_p9 = scmp.lt.s32.totalorder %s466_s9, %s459_s4 }
  0x38   : > { %p463_p13 = pneg %p462_p5  ;;  %p469_p2 = por %p468_p9, %p467_p4 }
  0x3a   : > { %p470_p1 = pnand %p469_p2, %p463_p13 }
  0x3c   : > { %473 = shalt.err (!%p470_p1)
}
  0x3d   : > { %381 = dma.hbm_to_vmem [thread:$0]  (!%p669_p10), %s667_s12, 128, %s673_s18, %s148_s22  }
  0x3e   : > { %167 = sbr.rel (%p615_p8) target bundleno = 164 (0xa4), region = 32  ;;  %p785_p6 = scmp.eq.s32.totalorder (!%p615_p8), %s593_s0, 0 }
  0x45   : > { %519 = dma.done.wait (%p785_p6), [#allocation6], 16   ;;  %p786_p12 = pmov %p785_p6 }
  0x46   : > { %s707_s10 = sand.u32 1, %s536_s15   ;;  %p787_p4 = scmp.ne.s32.totalorder %s777_s19, 0 }
  0x47   : > { %521 = vsyncadd (%p786_p12), [#allocation6], 4294967280  ;;  %s354_s11 = sshll.u32 %s707_s10, 3  ;;  %s174_s13 = scalar_lea.sflag [#allocation4], %s707_s10 }
  0x48   : > { %s713_s12 = scalar_lea.vmem [#allocation7], %s354_s11 }
  0x49   : > { %523 = dma.done.wait (%p787_p4), %s174_s13, 128  }
  0x4a   : > { %525 = vsyncadd (%p787_p4), %s174_s13, 4294967168 }
  0x4b   : > { %182 = sfence }
  0x4c   : > { %s356_s24 = sshll.u32 %s593_s0, 3  ;;  %v202_v0 = vlaneseq  ;;  %s210_s18 = sld [smem:[#allocation2]]  ;;  %v245_v35 = vld [vmem:[%s713_s12] sm:$0xff] }
  0x4d   : > { %v204_v1 = vstv %s356_s24  ;;  %s229_s19 = sld [smem:[#allocation3]]  ;;  %s361_s22 = sld [smem:[#allocation3 + $0x1]] }
  0x4e   : > { %v203_v2 = vshrl.u32 %v202_v0, 7  ;;  %v207_v4 = vand.u32 127, %v202_v0  ;;  %s200_s23 = scalar_lea.vmem [#allocation8], %s354_s11  ;;  %s363_s27 = sshll.u32 %s593_s0, 7 }
  0x4f   : > { %s264_s26 = sshll.u32 %s200_s23, 4  ;;  %s729_s30 = scalar_lea.hbm %s773_s3, %s363_s27  ;;  %s724_s26 = int_to_ptr.vmem [resolvable:$true] %s264_s26 }
  0x50   : > { %v205_v3 = vadd.s32 %v204_v1, %v203_v2  ;;  %s251_s4 = scalar_lea.sflag [#allocation5], %s707_s10  ;;  %s474_s7 = scalar_lea.vmem %s724_s26, 128 }
  0x51   : > { %p475_p8 = scmp.ne.s32.totalorder %s724_s26, %s474_s7  ;;  %p788_p13 = scmp.ne.s32.totalorder %s783_s6, 0 }
  0x52   : > { %v208_v5 = vmul.u32 128, %v205_v3  ;;  %s211_s21 = smul.u32 2654435769, %s210_s18  ;;  %s548_s0 = smov [#allocation8]  }
  0x53   : > { %v234_v24 = vstv %s229_s19  ;;  %v246_v33 = vstv %s361_s22  ;;  %p476_p10 = pnand %p475_p8, %p788_p13  ;;  %s478_s8 = sshll.u32 %s548_s0, 4  ;;  %s479_s8 = int_to_ptr.vmem [resolvable:$false] %s478_s8 }
  0x54   : > { %v209_v6 = vadd.s32 %v208_v5, %v207_v4  ;;  %v212_v7 = vstv %s211_s21  ;;  %s480_s9 = scalar_lea.vmem %s479_s8, 256  ;;  %p481_p0 = scmp.lt.s32.totalorder %s724_s26, %s479_s8 }
  0x55   : > { %p477_p7 = pneg %p476_p10  ;;  %p482_p3 = scmp.lt.s32.totalorder %s480_s9, %s474_s7 }
  0x56   : > { %v213_v8 = vadd.s32 %v212_v7, %v209_v6 }
  0x57   : > { %p483_p11 = por %p482_p3, %p481_p0 }
  0x58   : > { %v357_v9 = vshrl.u32 %v213_v8, 16 }
  0x59   : > { %p484_p5 = pnand %p483_p11, %p477_p7 }
  0x5a   : > { %v216_v10 = vxor.u32 %v357_v9, %v213_v8 }
  0x5c   : > { %v217_v11 = vmul.u32 2246822507, %v216_v10 }
  0x5e   : > { %v358_v12 = vshrl.u32 %v217_v11, 13 }
  0x60   : > { %v220_v13 = vxor.u32 %v358_v12, %v217_v11 }
  0x62   : > { %v221_v14 = vmul.u32 3266489909, %v220_v13 }
  0x64   : > { %v359_v15 = vshrl.u32 %v221_v14, 16 }
  0x66   : > { %v224_v16 = vxor.u32 %v359_v15, %v221_v14 }
  0x68   : > { %v360_v17 = vshrl.u32 %v224_v16, 8 }
  0x6a   : > { %v227_v18 = vcvt.s32.f32 %v360_v17 }
  0x6c   : > { %v228_v19 = vmul.f32 5.9604645e-08, %v227_v18 }
  0x6e   : > { %v231_v20 = vadd.f32 1e-07, %v228_v19  ;;  %v236_v21 = vsub.f32 1.0, %v228_v19 }
  0x70   : > { %423 = vlog2.f32 %v231_v20  ;;  %v237_v22 = vadd.f32 1e-07, %v236_v21 }
  0x72   : > { %425 = vlog2.f32 %v237_v22 }
  0x7a   : > { %v424_v23 = vpop.eup %423 }
  0x7b   : > { %v233_v25 = vmul.f32 0.6931472, %v424_v23 }
  0x7c   : > { %v426_v26 = vpop.eup %425 }
  0x7d   : > { %v235_v27 = vadd.f32 %v234_v24, %v233_v25  ;;  %v239_v28 = vmul.f32 0.6931472, %v426_v26 }
  0x7f   : > { %v240_v29 = vsub.f32 %v235_v27, %v239_v28 }
  0x81   : > { %v241_v30 = vmul.f32 -0.05, %v240_v29 }
  0x83   : > { %427 = vtanh.f32 %v241_v30 }
  0x8d   : > { %v428_v31 = vpop.eup %427 }
  0x8e   : > { %v243_v32 = vadd.f32 1.0, %v428_v31 }
  0x90   : > { %v244_v34 = vmul.f32 0.5, %v243_v32 }
  0x92   : > { %v247_v36 = vmul.f32 %v246_v33, %v244_v34 }
  0x94   : > { %v248_v37 = vmul.f32 %v247_v36, %v245_v35 }
  0x96   : > { %249 = vst [vmem:[%s200_s23] sm:$0xff] %v248_v37 }
  0x97   : > { %487 = shalt.err (!%p484_p5)
}
  0x98   : > { %s488_s10 = scalar_lea.hbm %s729_s30, 128  ;;  %s492_s12 = scalar_lea.hbm %s773_s3, 512 }
  0x99   : > { %p489_p9 = scmp.ne.s32.totalorder %s729_s30, %s488_s10  ;;  %p493_p6 = scmp.lt.u32.totalorder %s729_s30, %s773_s3 }
  0x9a   : > { %p494_p12 = scmp.lt.u32.totalorder %s492_s12, %s488_s10  ;;  %p496_p8 = scmp.lt.u32.totalorder %s488_s10, %s729_s30 }
  0x9b   : > { %p490_p2 = pnand %p489_p9, %p788_p13 }
  0x9c   : > { %p495_p4 = por %p494_p12, %p493_p6 }
  0x9d   : > { %p491_p1 = pneg %p490_p2 }
  0x9e   : > { %p497_p10 = por %p496_p8, %p495_p4 }
  0xa0   : > { %p498_p7 = pnand %p497_p10, %p491_p1 }
  0xa2   : > { %501 = shalt.err (!%p498_p7)
}
  0xa3   : > { %372 = dma.vmem_to_hbm [thread:$0]  (%p788_p13), %s724_s26, 128, %s729_s30, %s251_s4  }
  0xa4 PF: > { %p389_p0 = scmp.ge.s32.totalorder %s544_s17, 2  ;;  %s276_s21 = sand.u32 1, %s532_s14  }
  0xa5   : > { %p789_p3 = scmp.ne.s32.totalorder %s778_s20, 0  ;;  %s277_s19 = scalar_lea.sflag [#allocation5], %s276_s21 }
  0xa7   : > { %p383_p11 = pnand %p389_p0, %p789_p3 }
  0xa9   : > { %527 = dma.done.wait (!%p383_p11), %s277_s19, 128  }
  0xaa   : > { %529 = vsyncadd (!%p383_p11), %s277_s19, 4294967168  ;;  %p18_p5 = scmp.ge.s32.totalorder %s622_s25, 6   ;;  %s790_s14 = smov %s536_s15 }
  0xab   : > { %s791_s15 = smov %s540_s16  ;;  %s792_s16 = smov %s646_s5 }
  0xac   : > { %s793_s17 = smov %s622_s25  ;;  %20 = sbr.rel (!%p18_p5) target bundleno = 8 (0x8), region = 82 }
  0xb3   :  { %282 = vsyncpa [#allocation4], 1 }
  0xb4   :  { %284 = vsyncpa [#allocation4 + $0x1], 1 }
  0xb5   :  { %285 = vsyncpa [#allocation5], 1 }
  0xb6   :  { %287 = vsyncpa [#allocation5 + $0x1], 1 }
  0xb7   :  { %288 = vsyncpa [#allocation6], 1 }
  0xb8   :  { %290 = vsyncpa [#allocation6 + $0x1], 1 }

</bundles_post_ra>
